<compile_context>
chip_gen: v5e
topology: v5e:2x2
jax: 0.10.0
libtpu: 0.0.40
codegen_flags: <defaults>
</compile_context>

<pallas_src>
import jax
import jax.numpy as jnp
from jax import lax
from jax.experimental import pallas as pl
from jax.experimental.pallas import tpu as pltpu


# ----------------------------------------------------------------------------
# helpers
# ----------------------------------------------------------------------------
def _round_up(x, m):
    return (x + m - 1) // m * m


def _pick_rows(n, cap=512):
    """Largest row-tile <= cap that divides n (n is a multiple of 8)."""
    if n <= cap:
        return n
    for c in (512, 256, 128, 64, 32, 16, 8):
        if c <= cap and n % c == 0:
            return c
    return n


def _pick_cols(m, cap=1024):
    """Largest 128-multiple column tile <= cap that divides m."""
    if m <= cap:
        return m
    for c in (2048, 1024, 512, 256, 128):
        if c <= cap and m % c == 0:
            return c
    return m


def _pick_time_chunk(t, cap=8):
    """Largest divisor of t that is <= cap (timesteps per LSTM grid step)."""
    for c in range(min(t, cap), 0, -1):
        if t % c == 0:
            return c
    return 1


# ----------------------------------------------------------------------------
# Kernel 1: tiled matmul + bias (hoisted input projection  x @ W_ih + b)
# x, w are bf16; accumulate in f32.
# ----------------------------------------------------------------------------
def matmul_bias_kernel(x_ref, w_ref, b_ref, o_ref):
    o_ref[...] = (jnp.dot(x_ref[...], w_ref[...],
                          preferred_element_type=jnp.float32)
                  + b_ref[...]).astype(o_ref.dtype)


def run_matmul_bias(x, w, b):
    N, K = x.shape
    M = w.shape[1]
    bn = _pick_rows(N)
    bm = _pick_cols(M)
    # TODO(synk): add a K grid axis + f32 accumulator scratch when K (=Dp) is
    #             large enough that (bn,K)+(K,bm) tiles pressure VMEM (v7x).
    return pl.pallas_call(
        matmul_bias_kernel,
        out_shape=jax.ShapeDtypeStruct((N, M), jnp.float32),
        grid_spec=pltpu.PrefetchScalarGridSpec(
            num_scalar_prefetch=0,
            grid=(N // bn, M // bm),
            in_specs=[
                pl.BlockSpec((bn, K), lambda i, j: (i, 0)),
                pl.BlockSpec((K, bm), lambda i, j: (0, j)),
                pl.BlockSpec((1, bm), lambda i, j: (0, j)),
            ],
            out_specs=pl.BlockSpec((bn, bm), lambda i, j: (i, j))),
        compiler_params=pltpu.CompilerParams(
            dimension_semantics=("parallel", "parallel")),
    )(x, w, b)


# ----------------------------------------------------------------------------
# Kernel 2: LSTM recurrence.
# grid = (batch tiles ['parallel'], time chunks ['arbitrary']); each grid step
# runs Tc timesteps with an unrolled fori_loop.  Only h @ W_hh (bf16 weights,
# f32 accumulation) sits on the serial path; gx is precomputed by kernel 1.
# ----------------------------------------------------------------------------
def lstm_kernel(gx_ref, whh_ref, h0_ref, c0_ref,
                hs_ref, hT_ref, cT_ref, h_sc, c_sc):
    t = pl.program_id(1)
    Tc = gx_ref.shape[0]
    Dp = h_sc.shape[-1]

    @pl.when(t == 0)
    def _():
        h_sc[...] = h0_ref[...]
        c_sc[...] = c0_ref[...]

    def step(tc, carry):
        h, c = carry
        # gate order i, f, g, o (PyTorch packed layout); each gate is Dp lanes
        # wide so every slice is 128-lane aligned.
        gates = gx_ref[tc] + jnp.dot(h.astype(jnp.bfloat16), whh_ref[...],
                                     preferred_element_type=jnp.float32)
        i = jax.nn.sigmoid(gates[:, 0 * Dp:1 * Dp])
        f = jax.nn.sigmoid(gates[:, 1 * Dp:2 * Dp])
        g = jnp.tanh(gates[:, 2 * Dp:3 * Dp])
        o = jax.nn.sigmoid(gates[:, 3 * Dp:4 * Dp])
        c_new = f * c + i * g
        h_new = o * jnp.tanh(c_new)
        hs_ref[tc] = h_new.astype(hs_ref.dtype)
        return (h_new, c_new)

    h, c = lax.fori_loop(0, Tc, step, (h_sc[...], c_sc[...]), unroll=True)
    h_sc[...] = h
    c_sc[...] = c

    # final state written once, on the last time chunk only (saves a vst per
    # step on the serial path; the constant out-block is written back once).
    @pl.when(t == pl.num_programs(1) - 1)
    def _():
        hT_ref[...] = h.astype(hT_ref.dtype)
        cT_ref[...] = c.astype(cT_ref.dtype)


def run_lstm(gx, whh, h0, c0, *, bb=8, tc_cap=8):
    T, Bp, G = gx.shape            # G = 4 * Dp
    Dp = whh.shape[0]
    Bb = min(Bp, bb)               # batch tile (multiple of 8; Bp % Bb == 0)
    Tc = _pick_time_chunk(T, tc_cap)
    # NOTE(production/v7x): pipeline_mode=pl.Buffered(1) on whh/h0/c0 halves
    # their double-buffered VMEM footprint; unnecessary at these demo sizes.
    return pl.pallas_call(
        lstm_kernel,
        out_shape=(jax.ShapeDtypeStruct((T, Bp, Dp), jnp.float32),  # hiddens
                   jax.ShapeDtypeStruct((Bp, Dp), jnp.float32),     # d_h
                   jax.ShapeDtypeStruct((Bp, Dp), jnp.float32)),    # d_c
        grid_spec=pltpu.PrefetchScalarGridSpec(
            num_scalar_prefetch=0,
            grid=(Bp // Bb, T // Tc),
            in_specs=[
                pl.BlockSpec((Tc, Bb, G), lambda b, t: (t, b, 0)),
                pl.BlockSpec((Dp, G), lambda b, t: (0, 0)),
                pl.BlockSpec((Bb, Dp), lambda b, t: (b, 0)),
                pl.BlockSpec((Bb, Dp), lambda b, t: (b, 0)),
            ],
            out_specs=[
                pl.BlockSpec((Tc, Bb, Dp), lambda b, t: (t, b, 0)),
                pl.BlockSpec((Bb, Dp), lambda b, t: (b, 0)),
                pl.BlockSpec((Bb, Dp), lambda b, t: (b, 0)),
            ],
            scratch_shapes=[pltpu.VMEM((Bb, Dp), jnp.float32),
                            pltpu.VMEM((Bb, Dp), jnp.float32)]),
        compiler_params=pltpu.CompilerParams(
            dimension_semantics=("parallel", "arbitrary")),
    )(gx, whh, h0, c0)


# ----------------------------------------------------------------------------
# Kernel 3: 'dot' attention, batch-tiled 'parallel' grid.
# Consumes time-major hs / video directly (no HBM transpose); softmax uses
# exact division (review correctness concern re: approx reciprocal).
# ----------------------------------------------------------------------------
def attn_kernel(h_ref, v_ref, w_ref, ctx_ref):
    h = h_ref[...]            # (T,  Bb, Dp) decoder hiddens (time-major)
    v = v_ref[...]            # (Te, Bb, Dp) encoder states (video_state)
    scores = jnp.einsum('tbd,ebd->bte', h, v,
                        preferred_element_type=jnp.float32)
    m = jnp.max(scores, axis=-1, keepdims=True)
    e = jnp.exp(scores - m)
    attn = e / jnp.sum(e, axis=-1, keepdims=True)       # softmax over dim=2
    w_ref[...] = attn
    ctx_ref[...] = jnp.einsum('bte,ebd->btd', attn, v,
                              preferred_element_type=jnp.float32)


def run_attn(hs_tm, video_p, *, bb=8):
    T, Bp, Dp = hs_tm.shape
    Te = video_p.shape[0]
    Bb = min(Bp, bb)
    # TODO(synk): at production Te, pad the encoder-time axis to 128 with a
    #             -inf additive mask before softmax for lane-dense attn_w stores.
    return pl.pallas_call(
        attn_kernel,
        out_shape=(jax.ShapeDtypeStruct((Bp, T, Te), jnp.float32),
                   jax.ShapeDtypeStruct((Bp, T, Dp), jnp.float32)),
        grid_spec=pltpu.PrefetchScalarGridSpec(
            num_scalar_prefetch=0,
            grid=(Bp // Bb,),
            in_specs=[pl.BlockSpec((T, Bb, Dp), lambda b: (0, b, 0)),
                      pl.BlockSpec((Te, Bb, Dp), lambda b: (0, b, 0))],
            out_specs=[pl.BlockSpec((Bb, T, Te), lambda b: (b, 0, 0)),
                       pl.BlockSpec((Bb, T, Dp), lambda b: (b, 0, 0))]),
        compiler_params=pltpu.CompilerParams(
            dimension_semantics=("parallel",)),
    )(hs_tm, video_p)


# ----------------------------------------------------------------------------
# Kernel 4: fused output head.  words_embedding = cat(hiddens, emb) is never
# materialized: W_cat is split and the two halves are contracted separately.
#   out = tanh(hs @ Wc_h + emb @ Wc_e + b_cat) @ W_lin + b_lin
# hcat is computed once per row tile (j==0) and cached in a VMEM scratch while
# the vocab axis j ('arbitrary', inner) sweeps.
# ----------------------------------------------------------------------------
def head_kernel(hs_ref, emb_ref, wch_ref, wce_ref, bc_ref, wl_ref, bl_ref,
                o_ref, hcat_sc):
    @pl.when(pl.program_id(1) == 0)
    def _():
        z = (jnp.dot(hs_ref[...].astype(jnp.bfloat16), wch_ref[...],
                     preferred_element_type=jnp.float32)
             + jnp.dot(emb_ref[...], wce_ref[...],
                       preferred_element_type=jnp.float32)
             + bc_ref[...])
        hcat_sc[...] = jnp.tanh(z)
    o_ref[...] = (jnp.dot(hcat_sc[...].astype(jnp.bfloat16), wl_ref[...],
                          preferred_element_type=jnp.float32)
                  + bl_ref[...]).astype(o_ref.dtype)


def run_head(hs_flat, emb_flat, wch, wce, bc, wl, bl):
    N, Dp = hs_flat.shape
    Hp = wch.shape[1]
    Vp = wl.shape[1]
    bn = _pick_rows(N)
    bv = _pick_cols(Vp)
    # NOTE: j-inner keeps hcat cached; at production N//bn > 1 the W_lin tiles
    # are re-streamed per row tile -- trade against keeping a wl tile resident.
    return pl.pallas_call(
        head_kernel,
        out_shape=jax.ShapeDtypeStruct((N, Vp), jnp.float32),
        grid_spec=pltpu.PrefetchScalarGridSpec(
            num_scalar_prefetch=0,
            grid=(N // bn, Vp // bv),
            in_specs=[
                pl.BlockSpec((bn, Dp), lambda i, j: (i, 0)),
                pl.BlockSpec((bn, Dp), lambda i, j: (i, 0)),
                pl.BlockSpec((Dp, Hp), lambda i, j: (0, 0)),
                pl.BlockSpec((Dp, Hp), lambda i, j: (0, 0)),
                pl.BlockSpec((1, Hp), lambda i, j: (0, 0)),
                pl.BlockSpec((Hp, bv), lambda i, j: (0, j)),
                pl.BlockSpec((1, bv), lambda i, j: (0, j)),
            ],
            out_specs=pl.BlockSpec((bn, bv), lambda i, j: (i, j)),
            scratch_shapes=[pltpu.VMEM((bn, Hp), jnp.float32)]),
        compiler_params=pltpu.CompilerParams(
            dimension_semantics=("parallel", "arbitrary")),
    )(hs_flat, emb_flat, wch, wce, bc, wl, bl)


# ----------------------------------------------------------------------------
# Parameter padding / casting to TPU-friendly shapes (once, outside hot path).
# Weights -> bf16; biases stay f32 (added to f32 accumulators).
# ----------------------------------------------------------------------------
def _pad_gate_cols(w, D, Dp):
    # columns are packed [i|f|g|o], each D wide; pad each gate to Dp lanes.
    parts = [w[:, k * D:(k + 1) * D] for k in range(4)]
    parts = [jnp.pad(p, ((0, 0), (0, Dp - D))) for p in parts]
    return jnp.concatenate(parts, axis=1)


def pad_params(params, hidden_size, out_size):
    # NOTE: b_lstm is b_ih + b_hh pre-summed; gate order must be PyTorch's
    # packed i,f,g,o layout (assert when loading real checkpoints).
    D = 2 * hidden_size
    Dp = _round_up(D, 128)       # production/v7x: consider 256 alignment
    Hp = _round_up(hidden_size, 128)
    Vp = _round_up(out_size, 128)
    wdt = jnp.bfloat16

    w_ih = jnp.pad(_pad_gate_cols(params["w_ih"], D, Dp),
                   ((0, Dp - D), (0, 0))).astype(wdt)
    w_hh = jnp.pad(_pad_gate_cols(params["w_hh"], D, Dp),
                   ((0, Dp - D), (0, 0))).astype(wdt)
    b_lstm = _pad_gate_cols(params["b_lstm"], D, Dp)                 # f32
    emb = jnp.pad(params["embedding"], ((0, 0), (0, Dp - D))).astype(wdt)
    w_cat_h = jnp.pad(params["w_cat"][:D],
                      ((0, Dp - D), (0, Hp - hidden_size))).astype(wdt)
    w_cat_e = jnp.pad(params["w_cat"][D:],
                      ((0, Dp - D), (0, Hp - hidden_size))).astype(wdt)
    b_cat = jnp.pad(params["b_cat"], ((0, 0), (0, Hp - hidden_size)))
    w_lin = jnp.pad(params["w_lin"],
                    ((0, Hp - hidden_size), (0, Vp - out_size))).astype(wdt)
    b_lin = jnp.pad(params["b_lin"], ((0, 0), (0, Vp - out_size)))
    return dict(embedding=emb, w_ih=w_ih, w_hh=w_hh, b_lstm=b_lstm,
                w_cat_h=w_cat_h, w_cat_e=w_cat_e, b_cat=b_cat,
                w_lin=w_lin, b_lin=b_lin,
                D=D, Dp=Dp, Hp=Hp, Vp=Vp, V=out_size)


# ----------------------------------------------------------------------------
# Full forward (glue in plain JAX: embedding gather, zero-padding; the only
# post-kernel transpose is on the small (T, B, V) logits block).
# ----------------------------------------------------------------------------
def s2vt_decoder_forward(pp, input_tokens, video_state, c):
    D, Dp, V = pp["D"], pp["Dp"], pp["V"]
    tokens = jnp.squeeze(input_tokens, axis=-1)              # (T, B), explicit axis
    T, B = tokens.shape
    Bp = _round_up(max(B, 8), 8)

    # pad dynamic inputs to (sublane=8, lane=128) granularity; zero padding is
    # inert (padded hidden columns stay exactly 0 through the LSTM gates).
    tokens_p = jnp.pad(tokens, ((0, 0), (0, Bp - B)))        # pad batch w/ token 0
    emb_tm = pp["embedding"][tokens_p]                       # (T, Bp, Dp) bf16; dropout: eval identity
    video_p = jnp.pad(video_state,
                      ((0, 0), (0, Bp - B), (0, Dp - D)))    # (Te, Bp, Dp)
    h0 = video_p[-1]                                         # video_state[-1:] -> (Bp, Dp)
    c0 = jnp.pad(c[0], ((0, Bp - B), (0, Dp - D)))           # (Bp, Dp)

    # hoisted input projection: one big MXU matmul outside the recurrence
    gx = run_matmul_bias(emb_tm.reshape(T * Bp, Dp), pp["w_ih"], pp["b_lstm"])
    gx = gx.reshape(T, Bp, 4 * Dp)

    # sequential LSTM: only h @ W_hh on the per-step critical path
    hs_tm, hT, cT = run_lstm(gx, pp["w_hh"], h0, c0)
    d_h = hT[:B, :D][None]
    d_c = cT[:B, :D][None]

    # attention ('dot') + attn_weight.bmm(video_state.transpose(0,1)),
    # consumed time-major (no HBM transpose of activations)
    attn_w_p, ctx_p = run_attn(hs_tm, video_p)
    attn_w = attn_w_p[:B]
    context = ctx_p[:B, :, :D]

    # mode == 'guide': words_embedding = cat(hiddens, embedded inputs); the
    # head consumes time-major flattened rows and only the small logits block
    # is reordered to the _time_flatten order (b*T + t).
    outs_p = run_head(hs_tm.reshape(T * Bp, Dp), emb_tm.reshape(T * Bp, Dp),
                      pp["w_cat_h"], pp["w_cat_e"], pp["b_cat"],
                      pp["w_lin"], pp["b_lin"])              # (T*Bp, Vp)
    outs = outs_p.reshape(T, Bp, -1)[:, :B, :V]              # (T, B, V)
    outs = jnp.transpose(outs, (1, 0, 2)).reshape(B * T, V)
    return outs, (d_h, d_c), (attn_w, context)


# ----------------------------------------------------------------------------
# Pure-JAX f32 reference for verification (unpadded, matches PyTorch math)
# ----------------------------------------------------------------------------
def reference_forward(params, input_tokens, video_state, c):
    tokens = jnp.squeeze(input_tokens, axis=-1)
    emb = params["embedding"][tokens]
    h0 = video_state[-1, :, :]
    c0 = c[0]

    def step(carry, xt):
        h, cs = carry
        g = xt @ params["w_ih"] + h @ params["w_hh"] + params["b_lstm"][0]
        i, f, gg, o = jnp.split(g, 4, axis=-1)
        i, f, o = jax.nn.sigmoid(i), jax.nn.sigmoid(f), jax.nn.sigmoid(o)
        gg = jnp.tanh(gg)
        cs = f * cs + i * gg
        h = o * jnp.tanh(cs)
        return (h, cs), h

    (hT, cT), hs = jax.lax.scan(step, (h0, c0), emb)
    scores = jnp.einsum('ebd,tbd->bte', video_state, hs)
    attn = jax.nn.softmax(scores, axis=2)
    ctx = jnp.einsum('bte,ebd->btd', attn, video_state)
    words = jnp.concatenate([hs, emb], axis=2)
    T, B, _ = words.shape
    flat = jnp.transpose(words, (1, 0, 2)).reshape(B * T, -1)
    h = jnp.tanh(flat @ params["w_cat"] + params["b_cat"][0])
    outs = h @ params["w_lin"] + params["b_lin"][0]
    return outs, hT[None], cT[None], attn, ctx


def init_params(key, out_size, hidden_size):
    D = 2 * hidden_size
    ks = jax.random.split(key, 8)
    s = 0.1
    return dict(
        embedding=jax.random.normal(ks[0], (out_size, D), jnp.float32) * s,
        w_ih=jax.random.normal(ks[1], (D, 4 * D), jnp.float32) * s,
        w_hh=jax.random.normal(ks[2], (D, 4 * D), jnp.float32) * s,
        b_lstm=jax.random.normal(ks[3], (1, 4 * D), jnp.float32) * s,  # b_ih+b_hh
        w_cat=jax.random.normal(ks[4], (2 * D, hidden_size), jnp.float32) * s,
        b_cat=jax.random.normal(ks[5], (1, hidden_size), jnp.float32) * s,
        w_lin=jax.random.normal(ks[6], (hidden_size, out_size), jnp.float32) * s,
        b_lin=jax.random.normal(ks[7], (1, out_size), jnp.float32) * s,
    )


def _check(name, got, want, tol):
    err = float(jnp.max(jnp.abs(got - want)))
    ref = float(jnp.max(jnp.abs(want)))
    assert err <= tol * (1.0 + ref), f"{name}: err={err:.3e} (max|ref|={ref:.3e})"


if __name__ == "__main__":
    key = jax.random.PRNGKey(0)
    out_size, hidden_size = 48, 32
    B, T_dec, T_enc = 2, 8, 8
    D = 2 * hidden_size

    kp, kt, kv, kc = jax.random.split(key, 4)
    params = init_params(kp, out_size, hidden_size)
    params_p = pad_params(params, hidden_size, out_size)

    input_tokens = jax.random.randint(kt, (T_dec, B, 1), 0, out_size,
                                      dtype=jnp.int32)
    video_state = jax.random.normal(kv, (T_enc, B, D), jnp.float32)
    c0 = jax.random.normal(kc, (1, B, D), jnp.float32)

    outs, (d_h, d_c), (attn_w, ctx) = s2vt_decoder_forward(
        params_p, input_tokens, video_state, c0)
    jax.block_until_ready((outs, d_h, d_c, attn_w, ctx))

    r_outs, r_dh, r_dc, r_w, r_ctx = reference_forward(
        params, input_tokens, video_state, c0)
    assert outs.shape == (B * T_dec, out_size)
    assert d_h.shape == (1, B, D) and d_c.shape == (1, B, D)
    # bf16 weights (f32 accumulation) -> compare against the f32 reference with
    # a bf16-appropriate normalized tolerance.
    _check("outs", outs, r_outs, 2e-2)
    _check("d_h", d_h, r_dh, 2e-2)
    _check("d_c", d_c, r_dc, 2e-2)
    _check("attn_w", attn_w, r_w, 5e-2)
    _check("context", ctx, r_ctx, 5e-2)
    print("KERNEL_OK")
</pallas_src>

<mosaic_0001>
module attributes {stable_mosaic.version = 11 : i64} {
  func.func @matmul_bias_kernel(%arg0: i32, %arg1: i32, %arg2: memref<64x128xbf16, #tpu.memory_space<vmem>>, %arg3: memref<128x512xbf16, #tpu.memory_space<vmem>>, %arg4: memref<1x512xf32, #tpu.memory_space<vmem>>, %arg5: memref<64x512xf32, #tpu.memory_space<vmem>>) attributes {dimension_semantics = [#tpu.dimension_semantics<parallel>, #tpu.dimension_semantics<parallel>], iteration_bounds = array<i64: 1, 1>, scalar_prefetch = 0 : i64, scratch_operands = 0 : i64, tpu.core_type = #tpu.core_type<tc>, window_params = [{transform_indices = @transform_0, window_bounds = array<i64: 64, 128>}, {transform_indices = @transform_1, window_bounds = array<i64: 128, 512>}, {transform_indices = @transform_2, window_bounds = array<i64: 1, 512>}, {transform_indices = @transform_3, window_bounds = array<i64: 64, 512>}]} {
    %c0 = arith.constant 0 : index
    %c0_0 = arith.constant 0 : index
    %0 = vector.load %arg2[%c0, %c0_0] : memref<64x128xbf16, #tpu.memory_space<vmem>>, vector<64x128xbf16>
    %c0_1 = arith.constant 0 : index
    %c0_2 = arith.constant 0 : index
    %1 = vector.load %arg3[%c0_1, %c0_2] : memref<128x512xbf16, #tpu.memory_space<vmem>>, vector<128x512xbf16>
    %cst = arith.constant dense<0.000000e+00> : vector<64x512xf32>
    %2 = tpu.matmul %0, %1, %cst {dimension_numbers = #tpu.dot_dimension_numbers<[1], [0], [0], [1], [0, 0, 1, 1], [], []>} : vector<64x128xbf16>, vector<128x512xbf16>, vector<64x512xf32> -> vector<64x512xf32>
    %c0_3 = arith.constant 0 : index
    %c0_4 = arith.constant 0 : index
    %3 = vector.load %arg4[%c0_3, %c0_4] : memref<1x512xf32, #tpu.memory_space<vmem>>, vector<1x512xf32>
    %4 = vector.broadcast %3 : vector<1x512xf32> to vector<64x512xf32>
    %5 = arith.addf %2, %4 : vector<64x512xf32>
    %c0_5 = arith.constant 0 : index
    %c0_6 = arith.constant 0 : index
    %6 = vector.load %arg5[%c0_5, %c0_6] : memref<64x512xf32, #tpu.memory_space<vmem>>, vector<64x512xf32>
    tpu.vector_store %arg5[%c0_5, %c0_6], %5 {strides = array<i32>} : memref<64x512xf32, #tpu.memory_space<vmem>>, vector<64x512xf32>,
    return
  }
  func.func @transform_0(%arg0: i32, %arg1: i32) -> (i32, i32) {
    %c0_i32 = arith.constant 0 : i32
    %c0_i32_0 = arith.constant 0 : i32
    return %arg0, %c0_i32 : i32, i32
  }
  func.func @transform_1(%arg0: i32, %arg1: i32) -> (i32, i32) {
    %c0_i32 = arith.constant 0 : i32
    %c0_i32_0 = arith.constant 0 : i32
    return %c0_i32, %arg1 : i32, i32
  }
  func.func @transform_2(%arg0: i32, %arg1: i32) -> (i32, i32) {
    %c0_i32 = arith.constant 0 : i32
    %c0_i32_0 = arith.constant 0 : i32
    return %c0_i32, %arg1 : i32, i32
  }
  func.func @transform_3(%arg0: i32, %arg1: i32) -> (i32, i32) {
    %c0_i32 = arith.constant 0 : i32
    return %arg0, %arg1 : i32, i32
  }
}

</mosaic_0001>

<bundles_post_ra>
// kernel: tpu_custom_call.1
= control target key start
LH: loop header
LB: loop body
LE: loop exit
PB: predicated region body
PF: predicated region fallthrough
CT: control target
= control target key end

     0   :  { %8 = vsyncpa [#allocation3], 0  ;;  %s836_s0 = inlined_call_operand.hbm [shape: bf16[64,128], index: 0, kind: input, shape index: {}]   ;;  %s837_s1 = inlined_call_operand.hbm [shape: bf16[128,512], index: 1, kind: input, shape index: {}]   ;;  %s838_s2 = inlined_call_operand.hbm [shape: f32[1,512], index: 2, kind: input, shape index: {}]   ;;  %s839_s3 = inlined_call_operand.hbm [shape: f32[64,512], index: 3, kind: output, shape index: {}]  }
   0x1   :  { %9 = vsyncpa [#allocation6], 0  ;;  %s28_s14 = sshll.u32 %s837_s1, 4  ;;  %s29_s14 = int_to_ptr.hbm [resolvable:$true] %s28_s14 }
   0x2   :  { %10 = vsyncpa [#allocation4], 0  ;;  %s754_s15 = smov [#allocation5]   ;;  %s15_s19 = sshll.u32 %s836_s0, 4  ;;  %s16_s19 = int_to_ptr.hbm [resolvable:$true] %s15_s19 }
   0x3   :  { %s30_s16 = sshll.u32 %s754_s15, 4  ;;  %s755_s20 = smov 256   ;;  %s31_s16 = int_to_ptr.vmem [resolvable:$true] %s30_s16 }
   0x4   :  { %s756_s21 = smov 16   ;;  %s757_s22 = smov [#allocation2]  }
   0x5   :  { %36 = dma.hbm_to_vmem [thread:$0]  %s29_s14, 4096, %s31_s16, [#allocation6], %s755_s20, %s755_s20, %s756_s21  }
   0x6   :  { %s17_s23 = sshll.u32 %s757_s22, 4  ;;  %s758_s24 = smov 64   ;;  %s18_s23 = int_to_ptr.vmem [resolvable:$true] %s17_s23 }
   0x7   :  { %s759_s25 = smov 4   ;;  %s42_s27 = sshll.u32 %s838_s2, 4  ;;  %s43_s27 = int_to_ptr.hbm [resolvable:$true] %s42_s27 }
   0x8   :  { %23 = dma.hbm_to_vmem [thread:$0]  %s16_s19, 512, %s18_s23, [#allocation3], %s758_s24, %s758_s24, %s759_s25  }
   0x9   :  { %s760_s28 = smov [#allocation7]  }
   0xa   :  { %s44_s29 = sshll.u32 %s760_s28, 4  ;;  %s45_s29 = int_to_ptr.vmem [resolvable:$true] %s44_s29 }
   0xb   :  { %47 = dma.hbm_to_vmem [thread:$0]  %s43_s27, 64, %s45_s29, [#allocation6]  }
   0xc   :  { %748 = dma.done.wait [#allocation3], 512  }
   0xd   :  { %749 = vsyncadd [#allocation3], 4294966784 }
   0xe   :  { %750 = dma.done.wait [#allocation6], 4160  }
   0xf   :  { %751 = vsyncadd [#allocation6], 4294963136  ;;  %v592_v0 = vld [vmem:[#allocation5 + $0xe0] sm:$0xf]  ;;  %v640_v1 = vld [vmem:[#allocation5 + $0xec] sm:$0xf0] }
  0x10   :  { %v638_v2 = vld [vmem:[#allocation5 + $0xe4] sm:$0xf]  ;;  %v593_v3 = vor.u32 %v640_v1, %v592_v0  ;;  %v594_v4 = vld [vmem:[#allocation5 + $0xf0] sm:$0xf0]  ;;  %v600_v5 = vld [vmem:[#allocation5 + $0xe8] sm:$0xf] }
  0x11   :  { %v641_v6 = vld [vmem:[#allocation5 + $0xf4] sm:$0xf0]  ;;  %v597_v7 = vor.u32 %v638_v2, %v594_v4  ;;  %v639_v9 = vld [vmem:[#allocation5 + $0xec] sm:$0xf]  ;;  %v602_v10 = vld [vmem:[#allocation5 + $0xf8] sm:$0xf0] }
  0x12   :  { %v601_v8 = vor.u32 %v641_v6, %v600_v5  ;;  %v576_v11 = vld [vmem:[#allocation5 + $0xc0] sm:$0xf]  ;;  %294 = vmatpush.bf16.msra.mxu0 %v593_v3  ;;  %v605_v12 = vor.u32 %v639_v9, %v602_v10  ;;  %v636_v13 = vld [vmem:[#allocation5 + $0xcc] sm:$0xf0]  ;;  %v634_v14 = vld [vmem:[#allocation5 + $0xc4] sm:$0xf] }
  0x13   :  { %v578_v15 = vld [vmem:[#allocation5 + $0xd0] sm:$0xf0]  ;;  %323 = vmatpush.bf16.msra.mxu1 %v597_v7  ;;  %v577_v16 = vor.u32 %v636_v13, %v576_v11  ;;  %v584_v18 = vld [vmem:[#allocation5 + $0xc8] sm:$0xf]  ;;  %v637_v19 = vld [vmem:[#allocation5 + $0xd4] sm:$0xf0] }
  0x14   :  { %352 = vmatpush.bf16.msra.mxu2 %v601_v8  ;;  %v581_v17 = vor.u32 %v634_v14, %v578_v15  ;;  %v635_v20 = vld [vmem:[#allocation5 + $0xcc] sm:$0xf]  ;;  %381 = vmatpush.bf16.msra.mxu3 %v605_v12  ;;  %v585_v21 = vor.u32 %v637_v19, %v584_v18  ;;  %v586_v22 = vld [vmem:[#allocation5 + $0xd8] sm:$0xf0]  ;;  %v560_v23 = vld [vmem:[#allocation5 + $0xa0] sm:$0xf] }
  0x15   :  { %v632_v24 = vld [vmem:[#allocation5 + $0xac] sm:$0xf0]  ;;  %v589_v25 = vor.u32 %v635_v20, %v586_v22  ;;  %v630_v26 = vld [vmem:[#allocation5 + $0xa4] sm:$0xf]  ;;  %v562_v27 = vld [vmem:[#allocation5 + $0xb0] sm:$0xf0] }
  0x16   :  { %v568_v28 = vld [vmem:[#allocation5 + $0xa8] sm:$0xf]  ;;  %295 = vmatpush.bf16.msra.mxu0 %v577_v16  ;;  %v561_v29 = vor.u32 %v632_v24, %v560_v23  ;;  %v633_v30 = vld [vmem:[#allocation5 + $0xb4] sm:$0xf0]  ;;  %v631_v31 = vld [vmem:[#allocation5 + $0xac] sm:$0xf]  ;;  %v565_v33 = vor.u32 %v630_v26, %v562_v27 }
  0x17   :  { %v570_v32 = vld [vmem:[#allocation5 + $0xb8] sm:$0xf0]  ;;  %324 = vmatpush.bf16.msra.mxu1 %v581_v17  ;;  %v569_v34 = vor.u32 %v633_v30, %v568_v28  ;;  %v544_v35 = vld [vmem:[#allocation5 + $0x80] sm:$0xf]  ;;  %v628_v36 = vld [vmem:[#allocation5 + $0x8c] sm:$0xf0] }
  0x18   :  { %353 = vmatpush.bf16.msra.mxu2 %v585_v21  ;;  %v626_v37 = vld [vmem:[#allocation5 + $0x84] sm:$0xf]  ;;  %382 = vmatpush.bf16.msra.mxu3 %v589_v25  ;;  %v573_v38 = vor.u32 %v631_v31, %v570_v32  ;;  %v546_v39 = vld [vmem:[#allocation5 + $0x90] sm:$0xf0]  ;;  %v552_v40 = vld [vmem:[#allocation5 + $0x88] sm:$0xf]  ;;  %v545_v44 = vor.u32 %v628_v36, %v544_v35 }
  0x19   :  { %v629_v41 = vld [vmem:[#allocation5 + $0x94] sm:$0xf0]  ;;  %v627_v42 = vld [vmem:[#allocation5 + $0x8c] sm:$0xf]  ;;  %v554_v43 = vld [vmem:[#allocation5 + $0x98] sm:$0xf0]  ;;  %v549_v45 = vor.u32 %v626_v37, %v546_v39 }
  0x1a   :  { %296 = vmatpush.bf16.msra.mxu0 %v561_v29  ;;  %v553_v46 = vor.u32 %v629_v41, %v552_v40  ;;  %v528_v47 = vld [vmem:[#allocation5 + $0x60] sm:$0xf]  ;;  %v624_v48 = vld [vmem:[#allocation5 + $0x6c] sm:$0xf0]  ;;  %v622_v49 = vld [vmem:[#allocation5 + $0x64] sm:$0xf]  ;;  %v557_v50 = vor.u32 %v627_v42, %v554_v43 }
  0x1b   :  { %325 = vmatpush.bf16.msra.mxu1 %v565_v33  ;;  %v530_v51 = vld [vmem:[#allocation5 + $0x70] sm:$0xf0]  ;;  %v536_v52 = vld [vmem:[#allocation5 + $0x68] sm:$0xf]  ;;  %v625_v53 = vld [vmem:[#allocation5 + $0x74] sm:$0xf0]  ;;  %v529_v56 = vor.u32 %v624_v48, %v528_v47 }
  0x1c   :  { %354 = vmatpush.bf16.msra.mxu2 %v569_v34  ;;  %383 = vmatpush.bf16.msra.mxu3 %v573_v38  ;;  %v623_v54 = vld [vmem:[#allocation5 + $0x6c] sm:$0xf]  ;;  %v538_v55 = vld [vmem:[#allocation5 + $0x78] sm:$0xf0]  ;;  %v533_v57 = vor.u32 %v622_v49, %v530_v51  ;;  %v537_v58 = vor.u32 %v625_v53, %v536_v52  ;;  %v512_v59 = vld [vmem:[#allocation5 + $0x40] sm:$0xf] }
  0x1d   :  { %v620_v60 = vld [vmem:[#allocation5 + $0x4c] sm:$0xf0]  ;;  %v618_v61 = vld [vmem:[#allocation5 + $0x44] sm:$0xf]  ;;  %v541_v62 = vor.u32 %v623_v54, %v538_v55  ;;  %v514_v63 = vld [vmem:[#allocation5 + $0x50] sm:$0xf0] }
  0x1e   :  { %297 = vmatpush.bf16.msra.mxu0 %v545_v44  ;;  %v520_v0 = vld [vmem:[#allocation5 + $0x48] sm:$0xf]  ;;  %v621_v1 = vld [vmem:[#allocation5 + $0x54] sm:$0xf0]  ;;  %v619_v2 = vld [vmem:[#allocation5 + $0x4c] sm:$0xf]  ;;  %v513_v4 = vor.u32 %v620_v60, %v512_v59  ;;  %v517_v5 = vor.u32 %v618_v61, %v514_v63 }
  0x1f   :  { %326 = vmatpush.bf16.msra.mxu1 %v549_v45  ;;  %v522_v3 = vld [vmem:[#allocation5 + $0x58] sm:$0xf0]  ;;  %v521_v6 = vor.u32 %v621_v1, %v520_v0  ;;  %v496_v7 = vld [vmem:[#allocation5 + $0x20] sm:$0xf]  ;;  %v616_v8 = vld [vmem:[#allocation5 + $0x2c] sm:$0xf0] }
  0x20   :  { %355 = vmatpush.bf16.msra.mxu2 %v553_v46  ;;  %384 = vmatpush.bf16.msra.mxu3 %v557_v50  ;;  %v614_v9 = vld [vmem:[#allocation5 + $0x24] sm:$0xf]  ;;  %v525_v10 = vor.u32 %v619_v2, %v522_v3  ;;  %v498_v11 = vld [vmem:[#allocation5 + $0x30] sm:$0xf0]  ;;  %v504_v12 = vld [vmem:[#allocation5 + $0x28] sm:$0xf]  ;;  %v497_v16 = vor.u32 %v616_v8, %v496_v7 }
  0x21   :  { %v617_v13 = vld [vmem:[#allocation5 + $0x34] sm:$0xf0]  ;;  %v615_v14 = vld [vmem:[#allocation5 + $0x2c] sm:$0xf]  ;;  %v506_v15 = vld [vmem:[#allocation5 + $0x38] sm:$0xf0]  ;;  %v501_v17 = vor.u32 %v614_v9, %v498_v11 }
  0x22   :  { %298 = vmatpush.bf16.msra.mxu0 %v529_v56  ;;  %v505_v18 = vor.u32 %v617_v13, %v504_v12  ;;  %v480_v19 = vld [vmem:[#allocation5] sm:$0xf]  ;;  %v612_v20 = vld [vmem:[#allocation5 + $0xc] sm:$0xf0]  ;;  %v610_v21 = vld [vmem:[#allocation5 + $0x4] sm:$0xf]  ;;  %v509_v22 = vor.u32 %v615_v14, %v506_v15 }
  0x23   :  { %327 = vmatpush.bf16.msra.mxu1 %v533_v57  ;;  %v482_v23 = vld [vmem:[#allocation5 + $0x10] sm:$0xf0]  ;;  %v488_v24 = vld [vmem:[#allocation5 + $0x8] sm:$0xf]  ;;  %v613_v25 = vld [vmem:[#allocation5 + $0x14] sm:$0xf0]  ;;  %v481_v28 = vor.u32 %v612_v20, %v480_v19 }
  0x24   :  { %356 = vmatpush.bf16.msra.mxu2 %v537_v58  ;;  %385 = vmatpush.bf16.msra.mxu3 %v541_v62  ;;  %v611_v26 = vld [vmem:[#allocation5 + $0xc] sm:$0xf]  ;;  %v490_v27 = vld [vmem:[#allocation5 + $0x18] sm:$0xf0]  ;;  %v485_v29 = vor.u32 %v610_v21, %v482_v23  ;;  %v489_v30 = vor.u32 %v613_v25, %v488_v24  ;;  %v606_v32 = vld [vmem:[#allocation2] sm:$0xff]  ;;  %s761_s0 = smov [#allocation8]  }
  0x25   :  { %v493_v31 = vor.u32 %v611_v26, %v490_v27  ;;  %v607_v33 = vld [vmem:[#allocation2 + $0x8] sm:$0xff]  ;;  %v608_v34 = vld [vmem:[#allocation2 + $0x10] sm:$0xff]  ;;  %v609_v35 = vld [vmem:[#allocation2 + $0x18] sm:$0xff]  ;;  %s446_s2 = sshll.u32 %s761_s0, 4  ;;  %s448_s5 = sshll.u32 %s839_s3, 4  ;;  %s447_s2 = int_to_ptr.vmem [resolvable:$true] %s446_s2  ;;  %s449_s5 = int_to_ptr.hbm [resolvable:$true] %s448_s5 }
  0x26   :  { %299 = vmatpush.bf16.msra.mxu0 %v513_v4  ;;  %v100_v36 = vld [vmem:[#allocation7] sm:$0xf]  ;;  %s762_s6 = smov 512   ;;  %s763_s7 = smov 32  }
  0x27   :  { %328 = vmatpush.bf16.msra.mxu1 %v517_v5  ;;  %v793_v37 = vperm.slane %v100_v36, 0  ;;  %v795_v38 = vperm.slane %v100_v36, 1  ;;  %v799_v43 = vperm.slane %v100_v36, 2  ;;  %v801_v44 = vperm.slane %v100_v36, 3 }
  0x28   :  { %357 = vmatpush.bf16.msra.mxu2 %v521_v6  ;;  %386 = vmatpush.bf16.msra.mxu3 %v525_v10 }
  0x2a   :  { %300 = vmatpush.bf16.msra.mxu0 %v497_v16 }
  0x2b   :  { %329 = vmatpush.bf16.msra.mxu1 %v501_v17 }
  0x2c   :  { %358 = vmatpush.bf16.msra.mxu2 %v505_v18  ;;  %387 = vmatpush.bf16.msra.mxu3 %v509_v22 }
  0x2e   :  { %301 = vmatpush.bf16.msra.mxu0 %v481_v28 }
  0x2f   :  { %330 = vmatpush.bf16.msra.mxu1 %v485_v29 }
  0x30   :  { %359 = vmatpush.bf16.msra.mxu2 %v489_v30  ;;  %388 = vmatpush.bf16.msra.mxu3 %v493_v31 }
  0x31   :  { %302 = vmatmul.bf16.vlgmr.msra.gmra.mxu0 %v606_v32 }
  0x32   :  { %331 = vmatmul.bf16.vlgmr.msra.gmra.mxu1 %v606_v32 }
  0x33   :  { %360 = vmatmul.bf16.vlgmr.msra.gmra.mxu2 %v606_v32  ;;  %389 = vmatmul.bf16.vlgmr.msra.gmra.mxu3 %v606_v32 }
  0x41   :  { %307 = vmatmul.bf16.gmra.mxu0 %v607_v33 }
  0x42   :  { %336 = vmatmul.bf16.gmra.mxu1 %v607_v33 }
  0x43   :  { %365 = vmatmul.bf16.gmra.mxu2 %v607_v33  ;;  %394 = vmatmul.bf16.gmra.mxu3 %v607_v33 }
  0x51   :  { %312 = vmatmul.bf16.gmra.mxu0 %v608_v34 }
  0x52   :  { %341 = vmatmul.bf16.gmra.mxu1 %v608_v34 }
  0x53   :  { %370 = vmatmul.bf16.gmra.mxu2 %v608_v34  ;;  %399 = vmatmul.bf16.gmra.mxu3 %v608_v34 }
  0x61   :  { %317 = vmatmul.bf16.gmra.mxu0 %v609_v35 }
  0x62   :  { %346 = vmatmul.bf16.gmra.mxu1 %v609_v35 }
  0x63   :  { %375 = vmatmul.bf16.gmra.mxu2 %v609_v35  ;;  %404 = vmatmul.bf16.gmra.mxu3 %v609_v35 }
  0xae   :  { %v303_v39 = vpop.f32.mrf.mxu0 }
  0xaf   :  { %v304_v40 = vadd.f32 %v303_v39, %v793_v37  ;;  %v332_v41 = vpop.f32.mrf.mxu1 }
  0xb0   :  { %v333_v42 = vadd.f32 %v332_v41, %v795_v38 }
  0xb1   :  { %410 = vst [vmem:[#allocation8] sm:$0xff] %v304_v40 }
  0xb2   :  { %411 = vst [vmem:[#allocation8 + $0x8] sm:$0xff] %v333_v42 }
  0xb6   :  { %v361_v45 = vpop.f32.mrf.mxu2  ;;  %v390_v47 = vpop.f32.mrf.mxu3 }
  0xb7   :  { %v362_v46 = vadd.f32 %v361_v45, %v799_v43  ;;  %v305_v48 = vpop.f32.mrf.mxu0  ;;  %v391_v49 = vadd.f32 %v390_v47, %v801_v44  ;;  %v334_v51 = vpop.f32.mrf.mxu1 }
  0xb8   :  { %v306_v50 = vadd.f32 %v305_v48, %v793_v37  ;;  %v335_v52 = vadd.f32 %v334_v51, %v795_v38 }
  0xb9   :  { %412 = vst [vmem:[#allocation8 + $0x10] sm:$0xff] %v362_v46 }
  0xba   :  { %413 = vst [vmem:[#allocation8 + $0x18] sm:$0xff] %v391_v49 }
  0xbb   :  { %414 = vst [vmem:[#allocation8 + $0x20] sm:$0xff] %v306_v50 }
  0xbc   :  { %415 = vst [vmem:[#allocation8 + $0x28] sm:$0xff] %v335_v52 }
  0xbe   :  { %v363_v53 = vpop.f32.mrf.mxu2  ;;  %v392_v55 = vpop.f32.mrf.mxu3 }
  0xbf   :  { %v364_v54 = vadd.f32 %v363_v53, %v799_v43  ;;  %v308_v56 = vpop.f32.mrf.mxu0  ;;  %v393_v57 = vadd.f32 %v392_v55, %v801_v44  ;;  %v337_v59 = vpop.f32.mrf.mxu1 }
  0xc0   :  { %v309_v58 = vadd.f32 %v308_v56, %v793_v37  ;;  %v338_v60 = vadd.f32 %v337_v59, %v795_v38 }
  0xc1   :  { %416 = vst [vmem:[#allocation8 + $0x30] sm:$0xff] %v364_v54 }
  0xc2   :  { %417 = vst [vmem:[#allocation8 + $0x38] sm:$0xff] %v393_v57 }
  0xc3   :  { %418 = vst [vmem:[#allocation8 + $0x40] sm:$0xff] %v309_v58 }
  0xc4   :  { %419 = vst [vmem:[#allocation8 + $0x48] sm:$0xff] %v338_v60 }
  0xc6   :  { %v366_v61 = vpop.f32.mrf.mxu2  ;;  %v395_v63 = vpop.f32.mrf.mxu3 }
  0xc7   :  { %v367_v62 = vadd.f32 %v366_v61, %v799_v43  ;;  %v310_v0 = vpop.f32.mrf.mxu0  ;;  %v396_v1 = vadd.f32 %v395_v63, %v801_v44  ;;  %v339_v3 = vpop.f32.mrf.mxu1 }
  0xc8   :  { %v311_v2 = vadd.f32 %v310_v0, %v793_v37  ;;  %v340_v4 = vadd.f32 %v339_v3, %v795_v38 }
  0xc9   :  { %420 = vst [vmem:[#allocation8 + $0x50] sm:$0xff] %v367_v62 }
  0xca   :  { %421 = vst [vmem:[#allocation8 + $0x58] sm:$0xff] %v396_v1 }
  0xcb   :  { %422 = vst [vmem:[#allocation8 + $0x60] sm:$0xff] %v311_v2 }
  0xcc   :  { %423 = vst [vmem:[#allocation8 + $0x68] sm:$0xff] %v340_v4 }
  0xce   :  { %v368_v5 = vpop.f32.mrf.mxu2  ;;  %v397_v7 = vpop.f32.mrf.mxu3 }
  0xcf   :  { %v369_v6 = vadd.f32 %v368_v5, %v799_v43  ;;  %v313_v8 = vpop.f32.mrf.mxu0  ;;  %v398_v9 = vadd.f32 %v397_v7, %v801_v44  ;;  %v342_v11 = vpop.f32.mrf.mxu1 }
  0xd0   :  { %v314_v10 = vadd.f32 %v313_v8, %v793_v37  ;;  %v343_v12 = vadd.f32 %v342_v11, %v795_v38 }
  0xd1   :  { %424 = vst [vmem:[#allocation8 + $0x70] sm:$0xff] %v369_v6 }
  0xd2   :  { %425 = vst [vmem:[#allocation8 + $0x78] sm:$0xff] %v398_v9 }
  0xd3   :  { %426 = vst [vmem:[#allocation8 + $0x80] sm:$0xff] %v314_v10 }
  0xd4   :  { %427 = vst [vmem:[#allocation8 + $0x88] sm:$0xff] %v343_v12 }
  0xd6   :  { %v371_v13 = vpop.f32.mrf.mxu2  ;;  %v400_v15 = vpop.f32.mrf.mxu3 }
  0xd7   :  { %v372_v14 = vadd.f32 %v371_v13, %v799_v43  ;;  %v315_v16 = vpop.f32.mrf.mxu0  ;;  %v401_v17 = vadd.f32 %v400_v15, %v801_v44  ;;  %v344_v19 = vpop.f32.mrf.mxu1 }
  0xd8   :  { %v316_v18 = vadd.f32 %v315_v16, %v793_v37  ;;  %v345_v20 = vadd.f32 %v344_v19, %v795_v38 }
  0xd9   :  { %428 = vst [vmem:[#allocation8 + $0x90] sm:$0xff] %v372_v14 }
  0xda   :  { %429 = vst [vmem:[#allocation8 + $0x98] sm:$0xff] %v401_v17 }
  0xdb   :  { %430 = vst [vmem:[#allocation8 + $0xa0] sm:$0xff] %v316_v18 }
  0xdc   :  { %431 = vst [vmem:[#allocation8 + $0xa8] sm:$0xff] %v345_v20 }
  0xde   :  { %v373_v21 = vpop.f32.mrf.mxu2  ;;  %v402_v23 = vpop.f32.mrf.mxu3 }
  0xdf   :  { %v374_v22 = vadd.f32 %v373_v21, %v799_v43  ;;  %v318_v24 = vpop.f32.mrf.mxu0  ;;  %v403_v25 = vadd.f32 %v402_v23, %v801_v44  ;;  %v347_v27 = vpop.f32.mrf.mxu1 }
  0xe0   :  { %v319_v26 = vadd.f32 %v318_v24, %v793_v37  ;;  %v348_v28 = vadd.f32 %v347_v27, %v795_v38 }
  0xe1   :  { %432 = vst [vmem:[#allocation8 + $0xb0] sm:$0xff] %v374_v22 }
  0xe2   :  { %433 = vst [vmem:[#allocation8 + $0xb8] sm:$0xff] %v403_v25 }
  0xe3   :  { %434 = vst [vmem:[#allocation8 + $0xc0] sm:$0xff] %v319_v26 }
  0xe4   :  { %435 = vst [vmem:[#allocation8 + $0xc8] sm:$0xff] %v348_v28 }
  0xe6   :  { %v376_v29 = vpop.f32.mrf.mxu2  ;;  %v405_v31 = vpop.f32.mrf.mxu3 }
  0xe7   :  { %v377_v30 = vadd.f32 %v376_v29, %v799_v43  ;;  %v320_v32 = vpop.f32.mrf.mxu0  ;;  %v406_v33 = vadd.f32 %v405_v31, %v801_v44  ;;  %v349_v35 = vpop.f32.mrf.mxu1 }
  0xe8   :  { %v321_v34 = vadd.f32 %v320_v32, %v793_v37  ;;  %v350_v36 = vadd.f32 %v349_v35, %v795_v38 }
  0xe9   :  { %436 = vst [vmem:[#allocation8 + $0xd0] sm:$0xff] %v377_v30 }
  0xea   :  { %437 = vst [vmem:[#allocation8 + $0xd8] sm:$0xff] %v406_v33 }
  0xeb   :  { %438 = vst [vmem:[#allocation8 + $0xe0] sm:$0xff] %v321_v34 }
  0xec   :  { %439 = vst [vmem:[#allocation8 + $0xe8] sm:$0xff] %v350_v36 }
  0xee   :  { %v378_v39 = vpop.f32.mrf.mxu2  ;;  %v407_v41 = vpop.f32.mrf.mxu3 }
  0xef   :  { %v379_v40 = vadd.f32 %v378_v39, %v799_v43  ;;  %v408_v37 = vadd.f32 %v407_v41, %v801_v44 }
  0xf1   :  { %440 = vst [vmem:[#allocation8 + $0xf0] sm:$0xff] %v379_v40 }
  0xf2   :  { %441 = vst [vmem:[#allocation8 + $0xf8] sm:$0xff] %v408_v37 }
  0xf3   :  { %454 = dma.vmem_to_hbm [thread:$0]  %s447_s2, 4096, %s449_s5, [#allocation4], %s762_s6, %s762_s6, %s763_s7  }
  0xf4   :  { %752 = dma.done.wait [#allocation4], 4096  }
  0xf5   :  { %753 = vsyncadd [#allocation4], 4294963200 }
  0xf6   :  { %459 = vsyncpa [#allocation3], 1 }
  0xf7   :  { %460 = vsyncpa [#allocation6], 1 }
  0xf8   :  { %461 = vsyncpa [#allocation4], 1 }

</bundles_post_ra>
